<compile_context>
chip_gen: v7x
topology: tpu7x:2x2x1
jax: 0.10.0
libtpu: 0.0.40
codegen_flags: <defaults>
</compile_context>

<pallas_src>
import functools

import jax
import jax.numpy as jnp
from jax.experimental import pallas as pl
from jax.experimental.pallas import tpu as pltpu


# ----------------------------- Pallas kernel -------------------------------

def _basic_block_kernel(x_ref, w1_ref, w2_ref, bias_ref, o_ref, *, H):
    # x_ref: (R, W*Cin) bf16 with R = planes_per_block * H; rows = (plane, h),
    # lanes = (w, c_in).
    x = x_ref[...]                                            # bf16 (R, WCin)
    R = x.shape[0]

    bias = bias_ref[...]                                      # f32 (2, WC)
    b1 = bias[0:1, :]
    b2 = bias[1:2, :]

    # conv1 (1x1x1, no bias) + BN1 (scale folded into w1 on host) + ReLU.
    # Block-diagonal weight keeps the matmul lane-dense:
    # (R, W*Cin) @ (W*Cin, W*Cm) -> (R, W*Cm), f32 accumulation.
    y1 = jnp.dot(x, w1_ref[...], preferred_element_type=jnp.float32)
    y1 = jnp.maximum(y1 + b1, 0.0)                            # f32 (R, WCm)
    y1b = y1.astype(jnp.bfloat16)

    # H-boundary masks as (R, 1) columns (broadcast across lanes).  Rows are
    # (plane, h): a one-row shift must not cross plane boundaries, so zero
    # rows with h == 0 / h == H-1 (this also kills the roll wrap-around rows).
    h_ids = jax.lax.broadcasted_iota(jnp.int32, (R, 1), 0) % H
    not_first = (h_ids != 0).astype(jnp.float32)              # (R, 1)
    not_last = (h_ids != H - 1).astype(jnp.float32)           # (R, 1)

    t_up = (pltpu.roll(y1, shift=1, axis=0) * not_first).astype(jnp.bfloat16)
    t_dn = (pltpu.roll(y1, shift=R - 1, axis=0) * not_last).astype(jnp.bfloat16)

    # conv2 (1x3x3, pad (0,1,1)) + BN2 (scale folded into w2): three K=128
    # matmuls accumulated in f32.  The banded weight per H-tap encodes the
    # W-direction shifts and zero padding; no padded copies, no taps concat.
    y2 = jnp.dot(t_up, w2_ref[0], preferred_element_type=jnp.float32)
    y2 = y2 + jnp.dot(y1b, w2_ref[1], preferred_element_type=jnp.float32)
    y2 = y2 + jnp.dot(t_dn, w2_ref[2], preferred_element_type=jnp.float32)

    # bias + identity residual + ReLU; lane-dense bf16 store.
    out = jnp.maximum(y2 + b2 + x.astype(jnp.float32), 0.0)
    o_ref[...] = out.astype(o_ref.dtype)


# ------------------------------ host wrapper --------------------------------

def _choose_grid(nt, H, wc, vmem_budget_bytes=24 << 20):
    """Pick (num_steps, planes_per_step).

    Prefer 2 equal blocks (one per TensorCore on v7x; the extra step costs
    ~0.35us on single-core v5e/v6e).  Grow the step count only if one block
    would blow the VMEM budget (bf16 io double-buffers + f32 intermediates).
    """
    def block_bytes(pb):
        r = pb * H
        # 2x dbuf for x and out (bf16) + ~8 f32-equivalent in-kernel temps.
        return r * wc * (2 * 2 * 2 + 8 * 4)

    steps = 2 if nt % 2 == 0 else 1
    pb = nt // steps
    while pb > 1 and block_bytes(pb) > vmem_budget_bytes:
        steps += 1
        while nt % steps != 0:
            steps += 1
        pb = nt // steps
    return steps, pb


def basic_block_forward(x_ncdhw, lane_params):
    """Forward pass of BasicBlock (head_conv=1, stride=1, no downsample)."""
    N, Cin, T, H, W = x_ncdhw.shape
    WCin = W * Cin
    WCm = lane_params["w1bd"].shape[1]
    WCout = lane_params["w2b"].shape[2]
    assert WCout == WCin, "identity residual requires in_planes == planes"
    assert WCin % 128 == 0 and WCm % 128 == 0, "layout requires lane-dense W*C"

    NT = N * T
    num_steps, pb = _choose_grid(NT, H, max(WCin, WCm))
    R = pb * H                                  # rows per block (whole planes)
    assert R % H == 0                           # shifts never cross planes
    assert R % 8 == 0, "block sublane extent must be 8-aligned"
    grid = (num_steps,)

    # channels-last, lane-dense layout: rows = (n, t, h), lanes = (w, c).
    # Activations cross HBM in bf16 (kernel is memory-bound at real sizes).
    x2d = jnp.transpose(x_ncdhw, (0, 2, 3, 4, 1)).reshape(NT * H, WCin)
    x2d = x2d.astype(jnp.bfloat16)

    rows = NT * H
    flops = 2 * rows * (WCin * WCm + 3 * WCm * WCout)
    bytes_accessed = (rows * WCin * 2 + rows * WCout * 2
                      + (WCin * WCm + 3 * WCm * WCout) * 2 + 2 * WCout * 4)
    cost = pl.CostEstimate(flops=flops, transcendentals=0,
                           bytes_accessed=bytes_accessed)

    # Explicit VMEM budget (v7x has only 64 MiB physical; 32 MiB is safe on
    # every generation and far above what these blocks need).
    vmem_limit = 32 * 1024 * 1024

    out2d = pl.pallas_call(
        functools.partial(_basic_block_kernel, H=H),
        out_shape=jax.ShapeDtypeStruct((rows, WCout), jnp.bfloat16),
        grid_spec=pltpu.PrefetchScalarGridSpec(
            num_scalar_prefetch=0, grid=grid,
            in_specs=[
                pl.BlockSpec((R, WCin), lambda i: (i, 0)),
                # constant blocks: revisited (same index) -> DMA'd once
                pl.BlockSpec((WCin, WCm), lambda i: (0, 0)),
                pl.BlockSpec((3, WCm, WCout), lambda i: (0, 0, 0)),
                pl.BlockSpec((2, WCout), lambda i: (0, 0)),
            ],
            out_specs=pl.BlockSpec((R, WCout), lambda i: (i, 0)),
        ),
        compiler_params=pltpu.CompilerParams(
            dimension_semantics=("parallel",),
            vmem_limit_bytes=vmem_limit),
        cost_estimate=cost,
    )(x2d, lane_params["w1bd"], lane_params["w2b"], lane_params["bias"])

    cout = WCout // W
    return jnp.transpose(out2d.reshape(N, T, H, W, cout), (0, 4, 1, 2, 3))


# --------------------------- parameters / reference -------------------------

def init_raw_params(key, in_planes, planes):
    ks = jax.random.split(key, 10)
    return dict(
        w1_t=0.1 * jax.random.normal(ks[0], (planes, in_planes, 1, 1, 1)),
        w2_t=0.1 * jax.random.normal(ks[1], (planes, planes, 1, 3, 3)),
        g1=1.0 + 0.1 * jax.random.normal(ks[2], (planes,)),
        be1=0.1 * jax.random.normal(ks[3], (planes,)),
        rm1=0.1 * jax.random.normal(ks[4], (planes,)),
        rv1=jnp.abs(1.0 + 0.1 * jax.random.normal(ks[5], (planes,))),
        g2=1.0 + 0.1 * jax.random.normal(ks[6], (planes,)),
        be2=0.1 * jax.random.normal(ks[7], (planes,)),
        rm2=0.1 * jax.random.normal(ks[8], (planes,)),
        rv2=jnp.abs(1.0 + 0.1 * jax.random.normal(ks[9], (planes,))),
    )


def fold_params(raw, eps=1e-5):
    """Fold eval-mode BN into per-channel scale/bias; reorder conv weights."""
    s1 = raw["g1"] / jnp.sqrt(raw["rv1"] + eps)
    b1 = raw["be1"] - raw["rm1"] * s1
    s2 = raw["g2"] / jnp.sqrt(raw["rv2"] + eps)
    b2 = raw["be2"] - raw["rm2"] * s2
    w1 = jnp.transpose(raw["w1_t"][:, :, 0, 0, 0], (1, 0))        # (Cin, Cm)
    w2 = jnp.transpose(raw["w2_t"][:, :, 0], (2, 3, 1, 0))        # (3,3,Cm,Cout)
    return dict(w1=w1, w2=w2, s1=s1, b1=b1, s2=s2, b2=b2)


def build_lane_dense_params(folded, W):
    """Block-diagonal / banded weights (BN scales folded in) for lane layout."""
    # Fold BN scales into the conv weights (exact; ReLU/bias unaffected).
    w1 = folded["w1"] * folded["s1"][None, :]                        # (Cin, Cm)
    w2 = folded["w2"] * folded["s2"][None, None, None, :]            # (3,3,Cm,Co)
    Cin, Cm = w1.shape
    Cout = w2.shape[-1]

    # conv1: block-diagonal (W*Cin, W*Cm) so the matmul runs at lane width W*C.
    w1bd = jnp.zeros((W, Cin, W, Cm), jnp.float32)
    for w in range(W):
        w1bd = w1bd.at[w, :, w, :].set(w1)
    w1bd = w1bd.reshape(W * Cin, W * Cm).astype(jnp.bfloat16)

    # conv2: one banded (W*Cm, W*Cout) weight per H-tap; rows = (w_in, ci),
    # cols = (w_out, co).  Out-of-range taps are omitted == zero padding in W.
    w2b = jnp.zeros((3, W, Cm, W, Cout), jnp.float32)
    for dy in range(3):
        for w_out in range(W):
            for dx in range(3):
                w_in = w_out + dx - 1
                if 0 <= w_in < W:
                    w2b = w2b.at[dy, w_in, :, w_out, :].set(w2[dy, dx])
    w2b = w2b.reshape(3, W * Cm, W * Cout).astype(jnp.bfloat16)

    # biases stacked into one (2, W*C) input (row 0 = b1, row 1 = b2).
    bias = jnp.stack([jnp.tile(folded["b1"], W),
                      jnp.tile(folded["b2"], W)]).astype(jnp.float32)

    return dict(w1bd=w1bd, w2b=w2b, bias=bias)


def reference_forward(x_ncdhw, raw, eps=1e-5):
    hp = jax.lax.Precision.HIGHEST
    x = jnp.transpose(x_ncdhw, (0, 2, 3, 4, 1))                   # N,T,H,W,C
    y = jnp.einsum("nthwc,oc->nthwo", x, raw["w1_t"][:, :, 0, 0, 0],
                   precision=hp)
    y = (y - raw["rm1"]) / jnp.sqrt(raw["rv1"] + eps) * raw["g1"] + raw["be1"]
    y = jnp.maximum(y, 0.0)
    N, T, H, W, _ = y.shape
    yp = jnp.pad(y, ((0, 0), (0, 0), (1, 1), (1, 1), (0, 0)))
    out = jnp.zeros((N, T, H, W, raw["w2_t"].shape[0]), jnp.float32)
    for dy in range(3):
        for dx in range(3):
            out = out + jnp.einsum("nthwc,oc->nthwo",
                                   yp[:, :, dy:dy + H, dx:dx + W, :],
                                   raw["w2_t"][:, :, 0, dy, dx], precision=hp)
    out = (out - raw["rm2"]) / jnp.sqrt(raw["rv2"] + eps) * raw["g2"] + raw["be2"]
    out = jnp.maximum(out + x, 0.0)
    return jnp.transpose(out, (0, 4, 1, 2, 3))


# ----------------------------------- main ------------------------------------

if __name__ == "__main__":
    key = jax.random.PRNGKey(0)
    k_x, k_p = jax.random.split(key)

    N, C, T, H, W = 2, 8, 4, 16, 16          # in_planes = planes = 8; W*C = 128
    x = jax.random.normal(k_x, (N, C, T, H, W), jnp.float32)

    raw = init_raw_params(k_p, in_planes=C, planes=C)
    folded = fold_params(raw)
    lane_params = build_lane_dense_params(folded, W)

    out = jax.block_until_ready(basic_block_forward(x, lane_params))
    ref = jax.block_until_ready(reference_forward(x, raw))

    assert out.shape == (N, C, T, H, W)
    out_f32 = out.astype(jnp.float32)
    if not jnp.allclose(out_f32, ref, atol=5e-2, rtol=5e-2):
        max_err = float(jnp.max(jnp.abs(out_f32 - ref)))
        raise AssertionError(
            f"Pallas BasicBlock output mismatch vs reference (max abs err {max_err})")

    print("KERNEL_OK")
</pallas_src>

<mosaic_0001>
module attributes {stable_mosaic.version = 11 : i64} {
  func.func @_basic_block_kernel(%arg0: i32, %arg1: memref<64x128xbf16, #tpu.memory_space<vmem>>, %arg2: memref<128x128xbf16, #tpu.memory_space<vmem>>, %arg3: memref<3x128x128xbf16, #tpu.memory_space<vmem>>, %arg4: memref<2x128xf32, #tpu.memory_space<vmem>>, %arg5: memref<64x128xbf16, #tpu.memory_space<vmem>>) attributes {dimension_semantics = [#tpu.dimension_semantics<parallel>], iteration_bounds = array<i64: 2>, scalar_prefetch = 0 : i64, scratch_operands = 0 : i64, tpu.core_type = #tpu.core_type<tc>, window_params = [{transform_indices = @transform_0, window_bounds = array<i64: 64, 128>}, {pipeline_mode = #tpu.pipeline_mode<synchronous>, transform_indices = @transform_1, window_bounds = array<i64: 128, 128>}, {pipeline_mode = #tpu.pipeline_mode<synchronous>, transform_indices = @transform_2, window_bounds = array<i64: 3, 128, 128>}, {pipeline_mode = #tpu.pipeline_mode<synchronous>, transform_indices = @transform_3, window_bounds = array<i64: 2, 128>}, {transform_indices = @transform_4, window_bounds = array<i64: 64, 128>}]} {
    %c0 = arith.constant 0 : index
    %c0_0 = arith.constant 0 : index
    %0 = vector.load %arg1[%c0, %c0_0] : memref<64x128xbf16, #tpu.memory_space<vmem>>, vector<64x128xbf16>
    %c0_1 = arith.constant 0 : index
    %c0_2 = arith.constant 0 : index
    %1 = vector.load %arg4[%c0_1, %c0_2] : memref<2x128xf32, #tpu.memory_space<vmem>>, vector<2x128xf32>
    %2 = vector.extract_strided_slice %1 {offsets = [0, 0], sizes = [1, 128], strides = [1, 1]} : vector<2x128xf32> to vector<1x128xf32>
    %3 = vector.extract_strided_slice %1 {offsets = [1, 0], sizes = [1, 128], strides = [1, 1]} : vector<2x128xf32> to vector<1x128xf32>
    %c0_3 = arith.constant 0 : index
    %c0_4 = arith.constant 0 : index
    %4 = vector.load %arg2[%c0_3, %c0_4] : memref<128x128xbf16, #tpu.memory_space<vmem>>, vector<128x128xbf16>
    %cst = arith.constant dense<0.000000e+00> : vector<64x128xf32>
    %5 = tpu.matmul %0, %4, %cst {dimension_numbers = #tpu.dot_dimension_numbers<[1], [0], [0], [1], [0, 0, 1, 1], [], []>} : vector<64x128xbf16>, vector<128x128xbf16>, vector<64x128xf32> -> vector<64x128xf32>
    %6 = vector.broadcast %2 : vector<1x128xf32> to vector<64x128xf32>
    %7 = arith.addf %5, %6 : vector<64x128xf32>
    %cst_5 = arith.constant 0.000000e+00 : f32
    %8 = vector.broadcast %cst_5 : f32 to vector<64x128xf32>
    %9 = arith.maximumf %7, %8 : vector<64x128xf32>
    %10 = arith.truncf %9 : vector<64x128xf32> to vector<64x128xbf16>
    %11 = tpu.iota {dimensions = array<i32: 0>} : vector<64x1xi32>
    %c16_i32 = arith.constant 16 : i32
    %c0_i32 = arith.constant 0 : i32
    %12 = arith.cmpi eq, %c16_i32, %c0_i32 : i32
    %c1_i32 = arith.constant 1 : i32
    %13 = arith.select %12, %c1_i32, %c16_i32 : i32
    %14 = vector.broadcast %13 : i32 to vector<64x1xi32>
    %15 = arith.remsi %11, %14 : vector<64x1xi32>
    %c0_i32_6 = arith.constant 0 : i32
    %16 = vector.broadcast %c0_i32_6 : i32 to vector<64x1xi32>
    %17 = arith.cmpi ne, %15, %16 : vector<64x1xi32>
    %c0_i32_7 = arith.constant 0 : i32
    %18 = vector.broadcast %c0_i32_7 : i32 to vector<64x1xi32>
    %19 = arith.cmpi slt, %15, %18 : vector<64x1xi32>
    %c0_i32_8 = arith.constant 0 : i32
    %20 = arith.cmpi slt, %13, %c0_i32_8 : i32
    %21 = vector.broadcast %20 : i1 to vector<64x1xi1>
    %22 = vector.broadcast %21 : vector<64x1xi1> to vector<64x1xi1>
    %23 = arith.xori %19, %22 : vector<64x1xi1>
    %24 = arith.andi %23, %17 : vector<64x1xi1>
    %25 = vector.broadcast %13 : i32 to vector<64x1xi32>
    %26 = arith.addi %15, %25 : vector<64x1xi32>
    %27 = arith.select %24, %26, %15 : vector<64x1xi1>, vector<64x1xi32>
    %c0_i32_9 = arith.constant 0 : i32
    %28 = vector.broadcast %c0_i32_9 : i32 to vector<64x1xi32>
    %29 = arith.cmpi ne, %27, %28 : vector<64x1xi32>
    %30 = arith.extui %29 : vector<64x1xi1> to vector<64x1xi32>
    %31 = arith.sitofp %30 : vector<64x1xi32> to vector<64x1xf32>
    %c15_i32 = arith.constant 15 : i32
    %32 = vector.broadcast %c15_i32 : i32 to vector<64x1xi32>
    %33 = arith.cmpi ne, %27, %32 : vector<64x1xi32>
    %34 = arith.extui %33 : vector<64x1xi1> to vector<64x1xi32>
    %35 = arith.sitofp %34 : vector<64x1xi32> to vector<64x1xf32>
    %c1_i32_10 = arith.constant 1 : i32
    %36 = tpu.dynamic_rotate %9 by %c1_i32_10 dim 0 : vector<64x128xf32>, i32 -> vector<64x128xf32>
    %37 = vector.broadcast %31 : vector<64x1xf32> to vector<64x128xf32>
    %38 = arith.mulf %36, %37 : vector<64x128xf32>
    %39 = arith.truncf %38 : vector<64x128xf32> to vector<64x128xbf16>
    %c63_i32 = arith.constant 63 : i32
    %40 = tpu.dynamic_rotate %9 by %c63_i32 dim 0 : vector<64x128xf32>, i32 -> vector<64x128xf32>
    %41 = vector.broadcast %35 : vector<64x1xf32> to vector<64x128xf32>
    %42 = arith.mulf %40, %41 : vector<64x128xf32>
    %43 = arith.truncf %42 : vector<64x128xf32> to vector<64x128xbf16>
    %c0_11 = arith.constant 0 : index
    %c0_12 = arith.constant 0 : index
    %c0_13 = arith.constant 0 : index
    %44 = vector.load %arg3[%c0_11, %c0_12, %c0_13] : memref<3x128x128xbf16, #tpu.memory_space<vmem>>, vector<1x128x128xbf16>
    %45 = vector.shape_cast %44 : vector<1x128x128xbf16> to vector<128x128xbf16>
    %cst_14 = arith.constant dense<0.000000e+00> : vector<64x128xf32>
    %46 = tpu.matmul %39, %45, %cst_14 {dimension_numbers = #tpu.dot_dimension_numbers<[1], [0], [0], [1], [0, 0, 1, 1], [], []>} : vector<64x128xbf16>, vector<128x128xbf16>, vector<64x128xf32> -> vector<64x128xf32>
    %c1 = arith.constant 1 : index
    %c0_15 = arith.constant 0 : index
    %c0_16 = arith.constant 0 : index
    %47 = vector.load %arg3[%c1, %c0_15, %c0_16] : memref<3x128x128xbf16, #tpu.memory_space<vmem>>, vector<1x128x128xbf16>
    %48 = vector.shape_cast %47 : vector<1x128x128xbf16> to vector<128x128xbf16>
    %cst_17 = arith.constant dense<0.000000e+00> : vector<64x128xf32>
    %49 = tpu.matmul %10, %48, %cst_17 {dimension_numbers = #tpu.dot_dimension_numbers<[1], [0], [0], [1], [0, 0, 1, 1], [], []>} : vector<64x128xbf16>, vector<128x128xbf16>, vector<64x128xf32> -> vector<64x128xf32>
    %50 = arith.addf %46, %49 : vector<64x128xf32>
    %c2 = arith.constant 2 : index
    %c0_18 = arith.constant 0 : index
    %c0_19 = arith.constant 0 : index
    %51 = vector.load %arg3[%c2, %c0_18, %c0_19] : memref<3x128x128xbf16, #tpu.memory_space<vmem>>, vector<1x128x128xbf16>
    %52 = vector.shape_cast %51 : vector<1x128x128xbf16> to vector<128x128xbf16>
    %cst_20 = arith.constant dense<0.000000e+00> : vector<64x128xf32>
    %53 = tpu.matmul %43, %52, %cst_20 {dimension_numbers = #tpu.dot_dimension_numbers<[1], [0], [0], [1], [0, 0, 1, 1], [], []>} : vector<64x128xbf16>, vector<128x128xbf16>, vector<64x128xf32> -> vector<64x128xf32>
    %54 = arith.addf %50, %53 : vector<64x128xf32>
    %55 = vector.broadcast %3 : vector<1x128xf32> to vector<64x128xf32>
    %56 = arith.addf %54, %55 : vector<64x128xf32>
    %57 = arith.extf %0 : vector<64x128xbf16> to vector<64x128xf32>
    %58 = arith.addf %56, %57 : vector<64x128xf32>
    %cst_21 = arith.constant 0.000000e+00 : f32
    %59 = vector.broadcast %cst_21 : f32 to vector<64x128xf32>
    %60 = arith.maximumf %58, %59 : vector<64x128xf32>
    %61 = arith.truncf %60 : vector<64x128xf32> to vector<64x128xbf16>
    %c0_22 = arith.constant 0 : index
    %c0_23 = arith.constant 0 : index
    %62 = vector.load %arg5[%c0_22, %c0_23] : memref<64x128xbf16, #tpu.memory_space<vmem>>, vector<64x128xbf16>
    tpu.vector_store %arg5[%c0_22, %c0_23], %61 {strides = array<i32>} : memref<64x128xbf16, #tpu.memory_space<vmem>>, vector<64x128xbf16>,
    return
  }
  func.func @transform_0(%arg0: i32) -> (i32, i32) {
    %c0_i32 = arith.constant 0 : i32
    %c0_i32_0 = arith.constant 0 : i32
    return %arg0, %c0_i32 : i32, i32
  }
  func.func @transform_1(%arg0: i32) -> (i32, i32) {
    %c0_i32 = arith.constant 0 : i32
    %c0_i32_0 = arith.constant 0 : i32
    %c0_i32_1 = arith.constant 0 : i32
    return %c0_i32, %c0_i32_0 : i32, i32
  }
  func.func @transform_2(%arg0: i32) -> (i32, i32, i32) {
    %c0_i32 = arith.constant 0 : i32
    %c0_i32_0 = arith.constant 0 : i32
    %c0_i32_1 = arith.constant 0 : i32
    %c0_i32_2 = arith.constant 0 : i32
    return %c0_i32, %c0_i32_0, %c0_i32_1 : i32, i32, i32
  }
  func.func @transform_3(%arg0: i32) -> (i32, i32) {
    %c0_i32 = arith.constant 0 : i32
    %c0_i32_0 = arith.constant 0 : i32
    %c0_i32_1 = arith.constant 0 : i32
    return %c0_i32, %c0_i32_0 : i32, i32
  }
  func.func @transform_4(%arg0: i32) -> (i32, i32) {
    %c0_i32 = arith.constant 0 : i32
    %c0_i32_0 = arith.constant 0 : i32
    return %arg0, %c0_i32 : i32, i32
  }
}

</mosaic_0001>

<bundles_post_ra>
// kernel: tpu_custom_call.1
= control target key start
LH: loop header
LB: loop body
LE: loop exit
PB: predicated region body
PF: predicated region fallthrough
CT: control target
= control target key end

     0   :  { %9 = vsyncpa [#allocation3], 0  ;;  %s2152_s0 = inlined_call_operand.hbm [shape: bf16[128,128], index: 0, kind: input, shape index: {}]   ;;  %s2153_s1 = inlined_call_operand.hbm [shape: bf16[128,128], index: 1, kind: input, shape index: {}]   ;;  %s2154_s2 = inlined_call_operand.hbm [shape: bf16[3,128,128], index: 2, kind: input, shape index: {}]   ;;  %s2155_s3 = inlined_call_operand.vmem [shape: f32[2,128], index: 3, kind: input, shape index: {}]   ;;  %s2156_s4 = inlined_call_operand.hbm [shape: bf16[128,128], index: 4, kind: output, shape index: {}]  }
   0x1   :  { %11 = vsyncpa [#allocation3 + $0x1], 0 }
   0x2   :  { %12 = vsyncpa [#allocation6], 0 }
   0x3   :  { %13 = vsyncpa [#allocation4], 0 }
   0x4   :  { %15 = vsyncpa [#allocation4 + $0x1], 0  ;;  %s1783_s15 = smov 0   ;;  %s1785_s16 = smov 0  }
   0x5   :  { %s1787_s17 = smov 0   ;;  %s1789_s18 = smov 0  }
   0x6 LB: > { %s1804_s19 = sadd.s32 4294967295, %s1747_s18   ;;  %s1216_s20 = sadd.s32 4294967294, %s1747_s18   ;;  %s1747_s18 = sphi %s1789_s18, %s2182_s18   ;;  %s1743_s17 = sphi %s1787_s17, %s2181_s17   ;;  %s1739_s16 = sphi %s1785_s16, %s2180_s16   ;;  %s1735_s15 = sphi %s1783_s15, %s2179_s15  }
   0x7   : > { %p41_p0 = scmp.ne.s32.totalorder %s1739_s16, %s1735_s15  ;;  %p2157_p1 = scmp.eq.s32.totalorder %s1804_s19, 0 }
   0x8   : > { %p134_p3 = scmp.eq.s32.totalorder %s1216_s20, 1  ;;  %p1217_p5 = scmp.ge.s32.totalorder %s1747_s18, 1 }
   0x9   : > { %p1813_p4 = por %p2157_p1, %p41_p0  ;;  %p141_p7 = scmp.lt.s32.totalorder %s1747_s18, 3 }
   0xa   : > { %p1818_p6 = por %p134_p3, %p41_p0  ;;  %s1749_s24 = smov [#allocation5]  }
   0xb   : > { %s2160_s21 = scalar_select %p1813_p4, 1, 0 }
   0xc   : > { %s2161_s22 = scalar_select %p1818_p6, 1, 0 }
   0xd   : > { %p1823_p8 = pnand %p1217_p5, %p141_p7  ;;  %s153_s25 = sshll.u32 %s1749_s24, 4  ;;  %s1827_s25 = int_to_ptr.vmem [resolvable:$true] %s153_s25 }
   0xe   : > { %s1750_s27 = smov [#allocation7]   ;;  %s1591_s5 = scalar_lea.hbm %s2153_s1, 1024 }
   0xf   : > { %p1491_p9 = pneg %p1823_p8  ;;  %s166_s28 = sshll.u32 %s1750_s27, 4  ;;  %s1838_s28 = int_to_ptr.vmem [resolvable:$true] %s166_s28 }
  0x10   : > { %p1592_p12 = scmp.ne.s32.totalorder %s2153_s1, %s1591_s5  ;;  %p1598_p5 = scmp.lt.u32.totalorder %s1591_s5, %s2153_s1 }
  0x11   : > { %p1834_p11 = pnand %p1491_p9, %p2157_p1 }
  0x13   : > { %p1593_p13 = pneg %p1834_p11 }
  0x15   : > { %p1594_p0 = pnand %p1593_p13, %p1592_p12 }
  0x17   : > { %p1595_p3 = pneg %p1594_p0 }
  0x19   : > { %p1600_p7 = pnand %p1598_p5, %p1595_p3 }
  0x1b   : > { %1603 = shalt.err (!%p1600_p7)
}
  0x1c   : > { %s1604_s10 = scalar_lea.vmem %s1827_s25, 1024  ;;  %p1612_p2 = scmp.lt.s32.totalorder %s1827_s25, %s1827_s25 }
  0x1d   : > { %p1605_p9 = scmp.ne.s32.totalorder %s1827_s25, %s1604_s10  ;;  %p1613_p12 = scmp.lt.s32.totalorder %s1604_s10, %s1604_s10 }
  0x1f   : > { %p1607_p10 = pnand %p1605_p9, %p1593_p13  ;;  %p1614_p0 = por %p1613_p12, %p1612_p2 }
  0x21   : > { %p1608_p1 = pneg %p1607_p10 }
  0x23   : > { %p1615_p6 = pnand %p1614_p0, %p1608_p1 }
  0x25   : > { %1618 = shalt.err (!%p1615_p6)
}
  0x26   : > { %s1751_s11 = smov 64   ;;  %s1752_s12 = smov 4  }
  0x27   : > { %1494 = dma.hbm_to_vmem [thread:$0]  (!%p1834_p11), %s2153_s1, 1024, %s1827_s25, [#allocation6], %s1751_s11, %s1751_s11, %s1752_s12  }
  0x28   : > { %s1619_s27 = scalar_lea.hbm %s2154_s2, 3072 }
  0x29   : > { %p1620_p1 = scmp.ne.s32.totalorder %s2154_s2, %s1619_s27  ;;  %p1626_p10 = scmp.lt.u32.totalorder %s1619_s27, %s2154_s2 }
  0x2b   : > { %p1622_p2 = pnand %p1620_p1, %p1593_p13 }
  0x2d   : > { %p1623_p6 = pneg %p1622_p2 }
  0x2f   : > { %p1628_p3 = pnand %p1626_p10, %p1623_p6 }
  0x31   : > { %1631 = shalt.err (!%p1628_p3)
}
  0x32   : > { %s1632_s25 = scalar_lea.vmem %s1838_s28, 3072  ;;  %p1640_p12 = scmp.lt.s32.totalorder %s1838_s28, %s1838_s28 }
  0x33   : > { %p1633_p5 = scmp.ne.s32.totalorder %s1838_s28, %s1632_s25  ;;  %p1641_p0 = scmp.lt.s32.totalorder %s1632_s25, %s1632_s25 }
  0x35   : > { %p1635_p7 = pnand %p1633_p5, %p1593_p13  ;;  %p1642_p1 = por %p1641_p0, %p1640_p12 }
  0x37   : > { %p1636_p9 = pneg %p1635_p7 }
  0x39   : > { %p1643_p2 = pnand %p1642_p1, %p1636_p9 }
  0x3b   : > { %1646 = shalt.err (!%p1643_p2)
}
  0x3c   : > { %1497 = dma.hbm_to_vmem [thread:$0]  (!%p1834_p11), %s2154_s2, 3072, %s1838_s28, [#allocation6], %s1751_s11, %s1751_s11, %s1752_s12  }
  0x3d   : > { %s1899_s26 = sadd.s32 1, %s1747_s18   ;;  %s28_s9 = sadd.s32 1, %s1743_s17 }
  0x3e   : > { %s25_s10 = ssub.s32 %s1747_s18, %s1899_s26  ;;  %p35_p13 = scmp.ne.s32.totalorder %s1743_s17, %s1739_s16 }
  0x3f   : > { %p26_p6 = scmp.eq.s32.totalorder %s25_s10, 0  ;;  %p36_p10 = scmp.eq.s32.totalorder %s1747_s18, 0 }
  0x40   : > { %p2164_p3 = scmp.eq.s32.totalorder %s1804_s19, 1  ;;  %p1508_p7 = scmp.lt.s32.totalorder %s1747_s18, 2 }
  0x41   : > { %s1915_s14 = scalar_select %p26_p6, %s1743_s17, %s28_s9  }
  0x42   : > { %p1909_p5 = por %p2164_p3, %p35_p13  ;;  %p37_p9 = por %p36_p10, %p35_p13 }
  0x43   : > { %s183_s20 = sand.u32 1, %s1743_s17   ;;  %s1286_s28 = sshll.u32 %s1747_s18, 9 }
  0x44   : > { %s2165_s13 = scalar_select %p1909_p5, 1, 0 }
  0x45   : > { %s1221_s24 = sshll.u32 %s183_s20, 5  ;;  %s1922_s30 = scalar_lea.hbm %s2152_s0, %s1286_s28 }
  0x46   : > { %s187_s5 = scalar_lea.vmem [#allocation2], %s1221_s24  ;;  %p1926_p11 = pnand %p1508_p7, %p37_p9 }
  0x47   : > { %s194_s6 = sshll.u32 %s187_s5, 4  ;;  %s1930_s7 = scalar_lea.sflag [#allocation3], %s183_s20  ;;  %s1924_s6 = int_to_ptr.vmem [resolvable:$true] %s194_s6 }
  0x48   : > { %s1647_s8 = scalar_lea.hbm %s1922_s30, 512  ;;  %p1649_p0 = pneg %p1926_p11 }
  0x49   : > { %p1648_p12 = scmp.ne.s32.totalorder %s1922_s30, %s1647_s8  ;;  %s1652_s24 = scalar_lea.hbm %s2152_s0, 1024 }
  0x4a   : > { %p1653_p13 = scmp.lt.u32.totalorder %s1922_s30, %s2152_s0  ;;  %p1654_p6 = scmp.lt.u32.totalorder %s1652_s24, %s1647_s8 }
  0x4b   : > { %p1650_p1 = pnand %p1649_p0, %p1648_p12  ;;  %p1656_p3 = scmp.lt.u32.totalorder %s1647_s8, %s1922_s30 }
  0x4c   : > { %p1655_p10 = por %p1654_p6, %p1653_p13 }
  0x4d   : > { %p1651_p2 = pneg %p1650_p1 }
  0x4e   : > { %p1657_p7 = por %p1656_p3, %p1655_p10 }
  0x50   : > { %p1658_p9 = pnand %p1657_p7, %p1651_p2 }
  0x52   : > { %1661 = shalt.err (!%p1658_p9)
}
  0x53   : > { %s1662_s20 = scalar_lea.vmem %s1924_s6, 512  ;;  %s1753_s29 = smov [#allocation2]  }
  0x54   : > { %p1663_p12 = scmp.ne.s32.totalorder %s1924_s6, %s1662_s20  ;;  %s1667_s5 = sshll.u32 %s1753_s29, 4  ;;  %s1668_s5 = int_to_ptr.vmem [resolvable:$false] %s1667_s5 }
  0x55   : > { %s1669_s9 = scalar_lea.vmem %s1668_s5, 1024  ;;  %p1670_p4 = scmp.lt.s32.totalorder %s1924_s6, %s1668_s5 }
  0x56   : > { %p1665_p1 = pnand %p1663_p12, %p1649_p0  ;;  %p1671_p13 = scmp.lt.s32.totalorder %s1669_s9, %s1662_s20 }
  0x58   : > { %p1666_p5 = pneg %p1665_p1  ;;  %p1672_p6 = por %p1671_p13, %p1670_p4 }
  0x5a   : > { %p1673_p10 = pnand %p1672_p6, %p1666_p5 }
  0x5c   : > { %1676 = shalt.err (!%p1673_p10)
}
  0x5d   : > { %1501 = dma.hbm_to_vmem [thread:$0]  (!%p1926_p11), %s1922_s30, 512, %s1924_s6, %s1930_s7, %s1751_s11, %s1751_s11, %s1752_s12  }
  0x5e   : > { %206 = sbr.rel (%p1823_p8) target bundleno = 652 (0x28c), region = 36  ;;  %s1964_s8 = sand.u32 (!%p1823_p8), 1, %s1739_s16  }
  0x5f   : > { %s1225_s10 = sshll.u32 (!%p1823_p8), %s1964_s8, 5  ;;  %s209_s24 = scalar_lea.sflag (!%p1823_p8), [#allocation3], %s1964_s8 }
  0x60   : > { %s1970_s25 = scalar_lea.vmem (!%p1823_p8), [#allocation2], %s1225_s10  ;;  %p2167_p4 = scmp.ne.s32.totalorder (!%p1823_p8), %s2160_s21, 0 }
  0x65   : > { %1722 = dma.done.wait (%p2167_p4), %s209_s24, 512  }
  0x66   : > { %1724 = vsyncadd (%p2167_p4), %s209_s24, 4294966784  ;;  %p2168_p5 = scmp.eq.s32.totalorder %s1804_s19, 0 }
  0x68   : > { %1726 = dma.done.wait (%p2168_p5), [#allocation6], 4096   ;;  %p2169_p8 = pmov %p2168_p5 }
  0x69   : > { %v1551_v0 = vld [vmem:[#allocation5] sm:$0xff]   ;;  %v1552_v1 = vld [vmem:[#allocation5 + $0x8] sm:$0xff]   ;;  %v1553_v2 = vld [vmem:[#allocation5 + $0x10] sm:$0xff]   ;;  %v273_v29 = vlaneseq  ;;  %v1754_v58 = vmov 0.0   ;;  %s244_s11 = scalar_lea.vmem [#allocation8], %s1225_s10  ;;  %s1295_s30 = sshll.u32 %s1804_s19, 9 }
  0x6a   : > { %1728 = vsyncadd (%p2169_p8), [#allocation6], 4294963200  ;;  %1367 = vmatprep.subr.bf16.mxu0 %v1551_v0  ;;  %v1554_v3 = vld [vmem:[#allocation5 + $0x18] sm:$0xff]   ;;  %v1981_v4 = vld [vmem:[%s1970_s25] sm:$0xff]   ;;  %s1124_s12 = sshll.u32 %s244_s11, 4  ;;  %s2108_s28 = scalar_lea.hbm %s2156_s4, %s1295_s30  ;;  %s2103_s12 = int_to_ptr.vmem [resolvable:$true] %s1124_s12 }
  0x6b   : > { %1368 = vmatpush3.bf16.msra.mxu0 %v1551_v0  ;;  %1383 = vmatprep.mubr.bf16.mxu0 %v1981_v4  ;;  %v1555_v5 = vld [vmem:[#allocation5 + $0x20] sm:$0xff]   ;;  %v1568_v7 = vld [vmem:[#allocation7 + $0x8] sm:$0xff]   ;;  %v1570_v9 = vld [vmem:[#allocation7 + $0x10] sm:$0xff]   ;;  %v1999_v30 = vshrl.u32 %v273_v29, 7  ;;  %s1111_s27 = scalar_lea.sflag [#allocation4], %s1964_s8  ;;  %s1677_s19 = scalar_lea.vmem %s2103_s12, 512 }
  0x6c   : > { %1369 = vmatprep.subr.bf16.mxu0 %v1552_v1  ;;  %v1566_v6 = vld [vmem:[#allocation7] sm:$0xff]   ;;  %v1556_v8 = vld [vmem:[#allocation5 + $0x28] sm:$0xff]   ;;  %v1557_v10 = vld [vmem:[#allocation5 + $0x30] sm:$0xff]   ;;  %p1678_p11 = scmp.ne.s32.totalorder %s2103_s12, %s1677_s19  ;;  %p2176_p0 = scmp.ne.s32.totalorder %s2165_s13, 0 }
  0x6d   : > { %1415 = vmatprep.subr.bf16.mxu1 %v1566_v6  ;;  %v1558_v11 = vld [vmem:[#allocation5 + $0x38] sm:$0xff]   ;;  %v1985_v12 = vld [vmem:[%s1970_s25 + $0x8] sm:$0xff]   ;;  %v1988_v13 = vld [vmem:[%s1970_s25 + $0x10] sm:$0xff]   ;;  %v429_v31 = vadd.s32 16, %v1999_v30  ;;  %v275_v32 = vsub.s32 0, %v1999_v30  ;;  %v430_v33 = vadd.s32 24, %v1999_v30 }
  0x6e   : > { %1416 = vmatpush3.bf16.msra.mxu1 %v1566_v6  ;;  %v1563_v14 = vld [vmem:[#allocation7 + $0x40] sm:$0xff]   ;;  %v1564_v15 = vld [vmem:[#allocation7 + $0x48] sm:$0xff]   ;;  %v1993_v16 = vld [vmem:[%s1970_s25 + $0x18] sm:$0xff]   ;;  %v428_v34 = vadd.s32 8, %v1999_v30  ;;  %v431_v36 = vadd.s32 32, %v1999_v30  ;;  %v434_v37 = vadd.s32 56, %v1999_v30  ;;  %p1679_p2 = pnand %p1678_p11, %p2176_p0 }
  0x6f   : > { %1370 = vmatpush3.bf16.msra.mxu0 %v1552_v1  ;;  %1417 = vmatprep.subr.bf16.mxu1 %v1568_v7  ;;  %v1565_v17 = vld [vmem:[#allocation7 + $0x50] sm:$0xff]   ;;  %v1567_v18 = vld [vmem:[#allocation7 + $0x58] sm:$0xff]   ;;  %v1569_v19 = vld [vmem:[#allocation7 + $0x60] sm:$0xff]   ;;  %v453_v38 = vand.u32 15, %v429_v31  ;;  %v460_v40 = vand.u32 15, %v430_v33  ;;  %v433_v41 = vadd.s32 48, %v1999_v30 }
  0x70   : > { %1371 = vmatprep.subr.bf16.mxu0 %v1553_v2  ;;  %v1571_v20 = vld [vmem:[#allocation7 + $0x68] sm:$0xff]   ;;  %v1572_v21 = vld [vmem:[#allocation7 + $0x18] sm:$0xff]   ;;  %v1573_v22 = vld [vmem:[#allocation7 + $0x70] sm:$0xff]   ;;  %v446_v42 = vand.u32 15, %v428_v34  ;;  %v439_v43 = vand.u32 15, %v1999_v30  ;;  %v467_v44 = vand.u32 15, %v431_v36  ;;  %p1680_p3 = pneg %p1679_p2 }
  0x71   : > { %v1574_v23 = vld [vmem:[#allocation7 + $0x20] sm:$0xff]   ;;  %v1575_v24 = vld [vmem:[#allocation7 + $0x78] sm:$0xff]   ;;  %v1576_v25 = vld [vmem:[#allocation7 + $0x28] sm:$0xff]   ;;  %v432_v45 = vadd.s32 40, %v1999_v30  ;;  %v488_v46 = vand.u32 15, %v434_v37  ;;  %vm616_vm0 = vcmp.lt.s32.totalorder %v1999_v30, 7 }
  0x72   : > { %1418 = vmatpush3.bf16.msra.mxu1 %v1568_v7  ;;  %v1577_v26 = vld [vmem:[#allocation7 + $0x30] sm:$0xff]   ;;  %v1578_v27 = vld [vmem:[#allocation7 + $0x38] sm:$0xff]   ;;  %v1996_v28 = vld [vmem:[#allocation7 + $0x80] sm:$0xff]   ;;  %vm587_vm1 = vcmp.lt.s32.totalorder %v1999_v30, 1  ;;  %vm533_vm2 = vcmp.ne.s32.totalorder %v453_v38, 0  ;;  %vm2021_vm3 = vcmp.ne.s32.totalorder %v460_v40, 15 }
  0x73   : > { %1372 = vmatpush3.bf16.msra.mxu0 %v1553_v2  ;;  %1419 = vmatprep.subr.bf16.mxu1 %v1570_v9  ;;  %v2008_v35 = vld [vmem:[%s2155_s3] sm:$0x3]  ;;  %v481_v51 = vand.u32 15, %v433_v41  ;;  %vm556_vm4 = vcmp.ne.s32.totalorder %v446_v42, 15  ;;  %vm531_vm5 = vcmp.ne.s32.totalorder %v439_v43, 0  ;;  %vm535_vm6 = vcmp.ne.s32.totalorder %v467_v44, 0 }
  0x74   : > { %1373 = vmatprep.subr.bf16.mxu0 %v1554_v3  ;;  %v2013_v39 = vrot.slane %v2008_v35, %v275_v32  ;;  %v474_v54 = vand.u32 15, %v432_v45  ;;  %v1242_v59 = vsel %vm533_vm2, 1.0, %v1754_v58  ;;  %vm562_vm7 = vcmp.ne.s32.totalorder %v488_v46, 15  ;;  %s1755_s20 = smov [#allocation8]  }
  0x75   : > { %v1246_v62 = vsel %vm2021_vm3, 1.0, %v1754_v58  ;;  %v1245_v63 = vsel %vm556_vm4, 1.0, %v1754_v58  ;;  %v1241_v1 = vsel %vm531_vm5, 1.0, %v1754_v58  ;;  %v1243_v2 = vsel %vm535_vm6, 1.0, %v1754_v58  ;;  %s1681_s29 = sshll.u32 %s1755_s20, 4  ;;  %s1682_s29 = int_to_ptr.vmem [resolvable:$false] %s1681_s29 }
  0x76   : > { %1420 = vmatpush3.bf16.msra.mxu1 %v1570_v9  ;;  %vm2032_vm8 = vcmp.ne.s32.totalorder %v481_v51, 0  ;;  %vm2036_vm9 = vcmp.ne.s32.totalorder %v474_v54, 15  ;;  %s1683_s5 = scalar_lea.vmem %s1682_s29, 1024  ;;  %p1684_p7 = scmp.lt.s32.totalorder %s2103_s12, %s1682_s29 }
  0x77   : > { %1374 = vmatpush3.bf16.msra.mxu0 %v1554_v3  ;;  %1421 = vmatprep.subr.bf16.mxu1 %v1572_v21  ;;  %v1244_v42 = vsel %vm2032_vm8, 1.0, %v1754_v58  ;;  %p1685_p9 = scmp.lt.s32.totalorder %s1683_s5, %s1677_s19 }
  0x78   : > { %1375 = vmatprep.subr.bf16.mxu0 %v1555_v5 }
  0x79   : > { %p1686_p12 = por %p1685_p9, %p1684_p7 }
  0x7a   : > { %1422 = vmatpush3.bf16.msra.mxu1 %v1572_v21 }
  0x7b   : > { %1376 = vmatpush3.bf16.msra.mxu0 %v1555_v5  ;;  %1423 = vmatprep.subr.bf16.mxu1 %v1574_v23  ;;  %p1687_p1 = pnand %p1686_p12, %p1680_p3 }
  0x7c   : > { %1377 = vmatprep.subr.bf16.mxu0 %v1556_v8 }
  0x7e   : > { %1424 = vmatpush3.bf16.msra.mxu1 %v1574_v23 }
  0x7f   : > { %1378 = vmatpush3.bf16.msra.mxu0 %v1556_v8  ;;  %1425 = vmatprep.subr.bf16.mxu1 %v1576_v25  ;;  %v2040_v8 = vsel %vm562_vm7, 1.0, %v1754_v58 }
  0x80   : > { %1379 = vmatprep.subr.bf16.mxu0 %v1557_v10 }
  0x82   : > { %1426 = vmatpush3.bf16.msra.mxu1 %v1576_v25 }
  0x83   : > { %1380 = vmatpush3.bf16.msra.mxu0 %v1557_v10  ;;  %1427 = vmatprep.subr.bf16.mxu1 %v1577_v26 }
  0x84   : > { %1381 = vmatprep.subr.bf16.mxu0 %v1558_v11 }
  0x86   : > { %1428 = vmatpush3.bf16.msra.mxu1 %v1577_v26 }
  0x87   : > { %1382 = vmatpush3.bf16.msra.mxu0 %v1558_v11  ;;  %1429 = vmatprep.subr.bf16.mxu1 %v1578_v27 }
  0x88   : > { %1391 = vmatprep.subr.bf16.mxu0 %v1563_v14 }
  0x8a   : > { %1384 = vmatmul.mubr.bf16.vlgmr.msra.gmra.mrb[0].mxu0 %v1985_v12  ;;  %1430 = vmatpush3.bf16.msra.mxu1 %v1578_v27 }
  0x8b   : > { %1387 = vmatprep.mubr.bf16.mxu0 %v1988_v13  ;;  %1392 = vmatpush3.bf16.msra.mxu0 %v1563_v14 }
  0x8c   : > { %1393 = vmatprep.subr.bf16.mxu0 %v1564_v15  ;;  %1439 = vmatprep.subr.bf16.mxu1 %v1996_v28 }
  0x8f   : > { %1394 = vmatpush3.bf16.msra.mxu0 %v1564_v15 }
  0x90   : > { %1395 = vmatprep.subr.bf16.mxu0 %v1565_v17 }
  0x92   : > { %1388 = vmatmul.mubr.bf16.gmra.mrb[4].mxu0 %v1993_v16 }
  0x93   : > { %1396 = vmatpush3.bf16.msra.mxu0 %v1565_v17 }
  0x94   : > { %1397 = vmatprep.subr.bf16.mxu0 %v1567_v18 }
  0x97   : > { %1398 = vmatpush3.bf16.msra.mxu0 %v1567_v18 }
  0x98   : > { %1399 = vmatprep.subr.bf16.mxu0 %v1569_v19 }
  0x9b   : > { %1400 = vmatpush3.bf16.msra.mxu0 %v1569_v19 }
  0x9c   : > { %1401 = vmatprep.subr.bf16.mxu0 %v1571_v20 }
  0x9f   : > { %1402 = vmatpush3.bf16.msra.mxu0 %v1571_v20 }
  0xa0   : > { %1403 = vmatprep.subr.bf16.mxu0 %v1573_v22 }
  0xa3   : > { %1404 = vmatpush3.bf16.msra.mxu0 %v1573_v22 }
  0xa4   : > { %1405 = vmatprep.subr.bf16.mxu0 %v1575_v24 }
  0xa7   : > { %1406 = vmatpush3.bf16.msra.mxu0 %v1575_v24 }
 0x15d   : > { %v1385_v47 = vpop.f32.mrb[0].mxu0 }
 0x15e   : > { %v392_v48 = vadd.f32 %v1385_v47, %v2013_v39  ;;  %v383_v49 = vpop.f32.mrb[1].mxu0  ;;  %v1247_v47 = vsel %vm2036_vm9, 1.0, %v1754_v58 }
 0x15f   : > { %v384_v52 = vadd.f32 %v383_v49, %v2013_v39  ;;  %v1386_v53 = vpop.f32.mrb[2].mxu0 }
 0x160   : > { %v416_v55 = vmax.f32 %v392_v48, 0.0  ;;  %v395_v56 = vadd.f32 %v1386_v53, %v2013_v39  ;;  %v386_v57 = vpop.f32.mrb[3].mxu0 }
 0x161   : > { %v2027_v60 = vmax.f32 %v384_v52, 0.0  ;;  %v387_v61 = vadd.f32 %v386_v57, %v2013_v39 }
 0x162   : > { %v417_v0 = vmax.f32 %v395_v56, 0.0  ;;  %v581_v5 = vrot.slane %v416_v55, 7  ;;  %v610_v9 = vrot.slane %v416_v55, 1 }
 0x163   : > { %v415_v6 = vmax.f32 %v387_v61, 0.0  ;;  %v579_v19 = vrot.slane %v2027_v60, 7  ;;  %v608_v21 = vrot.slane %v2027_v60, 1 }
 0x164   : > { %v423_v10 = vpack.c.bf16 %v417_v0, %v416_v55  ;;  %v582_v11 = vrot.slane %v417_v0, 7  ;;  %v611_v14 = vrot.slane %v417_v0, 1 }
 0x165   : > { %v609_v15 = vrot.slane %v415_v6, 1  ;;  %v1389_v17 = vpop.f32.mrb[4].mxu0  ;;  %v422_v18 = vpack.c.bf16 %v415_v6, %v2027_v60  ;;  %v580_v20 = vrot.slane %v415_v6, 7 }
 0x166   : > { %v2047_v22 = vsel %vm616_vm0, %v610_v9, %v611_v14  ;;  %v408_v23 = vadd.f32 %v1389_v17, %v2013_v39  ;;  %v399_v24 = vpop.f32.mrb[5].mxu0  ;;  %v592_v25 = vsel %vm587_vm1, %v581_v5, %v582_v11 }
 0x167   : > { %v400_v26 = vadd.f32 %v399_v24, %v2013_v39  ;;  %v1390_v27 = vpop.f32.mrb[6].mxu0  ;;  %1407 = vmatprep.mubr.bf16.mxu0 %v422_v18  ;;  %v594_v29 = vsel %vm587_vm1, %v579_v19, %v580_v20  ;;  %v593_v31 = vsel %vm587_vm1, %v580_v20, %v581_v5  ;;  %v622_v32 = vsel %vm616_vm0, %v609_v15, %v610_v9  ;;  %v1582_v24 = vld [vmem:[#allocation7 + $0x98] sm:$0xff]  }
 0x168   : > { %v420_v33 = vmax.f32 %v408_v23, 0.0  ;;  %v411_v34 = vadd.f32 %v1390_v27, %v2013_v39  ;;  %v402_v36 = vpop.f32.mrb[7].mxu0  ;;  %1408 = vmatmul.mubr.bf16.vlgmr.msra.gmra.mrb[8].mxu0 %v423_v10  ;;  %v598_v37 = vmul.f32 %v1242_v59, %v593_v31  ;;  %v623_v38 = vsel %vm616_vm0, %v608_v21, %v609_v15  ;;  %v1581_v23 = vld [vmem:[#allocation7 + $0x90] sm:$0xff]  }
 0x169   : > { %v418_v40 = vmax.f32 %v400_v26, 0.0  ;;  %v403_v41 = vadd.f32 %v402_v36, %v2013_v39  ;;  %v626_v43 = vmul.f32 %v1245_v63, %v622_v32 }
 0x16a   : > { %v585_v44 = vrot.slane %v420_v33, 7  ;;  %v421_v45 = vmax.f32 %v411_v34, 0.0  ;;  %v605_v46 = vpack.c.bf16 %v592_v25, %v598_v37  ;;  %v614_v52 = vrot.slane %v420_v33, 1  ;;  %v1583_v25 = vld [vmem:[#allocation7 + $0xa0] sm:$0xff]  }
 0x16b   : > { %v583_v48 = vrot.slane %v418_v40, 7  ;;  %v612_v49 = vrot.slane %v418_v40, 1  ;;  %v419_v50 = vmax.f32 %v403_v41, 0.0  ;;  %v633_v51 = vpack.c.bf16 %v626_v43, %v623_v38 }
 0x16c   : > { %v586_v53 = vrot.slane %v421_v45, 7  ;;  %v615_v54 = vrot.slane %v421_v45, 1  ;;  %v425_v55 = vpack.c.bf16 %v421_v45, %v420_v33  ;;  %v1036_v37 = vsub.s32 1, %v1999_v30 }
 0x16d   : > { %v620_v39 = vsel %vm616_vm0, %v611_v14, %v612_v49  ;;  %v584_v56 = vrot.slane %v419_v50, 7  ;;  %v613_v57 = vrot.slane %v419_v50, 1  ;;  %v424_v59 = vpack.c.bf16 %v419_v50, %v418_v40 }
 0x16e   : > { %v628_v60 = vmul.f32 %v1246_v62, %v620_v39  ;;  %v595_v61 = vsel %vm587_vm1, %v586_v53, %v579_v19  ;;  %v591_v58 = vsel %vm587_vm1, %v582_v11, %v583_v48  ;;  %v588_v63 = vsel %vm587_vm1, %v585_v44, %v586_v53 }
 0x16f   : > { %1411 = vmatprep.mubr.bf16.mxu0 %v424_v59  ;;  %v596_v0 = vmul.f32 %v1241_v1, %v595_v61  ;;  %v590_v3 = vsel %vm587_vm1, %v583_v48, %v584_v56  ;;  %v600_v5 = vmul.f32 %v1243_v2, %v591_v58  ;;  %v589_v6 = vsel %vm587_vm1, %v584_v56, %v585_v44  ;;  %v1580_v2 = vld [vmem:[#allocation7 + $0x88] sm:$0xff]  }
 0x170   : > { %1412 = vmatmul.mubr.bf16.gmra.mrb[12].mxu0 %v425_v55  ;;  %v602_v62 = vmul.f32 %v1244_v42, %v589_v6  ;;  %v634_v7 = vpack.c.bf16 %v628_v60, %v2047_v22  ;;  %v618_v9 = vsel %vm616_vm0, %v613_v57, %v614_v52  ;;  %v619_v10 = vsel %vm616_vm0, %v612_v49, %v613_v57 }
 0x171   : > { %v604_v11 = vpack.c.bf16 %v594_v29, %v596_v0  ;;  %v606_v14 = vpack.c.bf16 %v590_v3, %v600_v5  ;;  %v630_v1 = vmul.f32 %v1247_v47, %v618_v9  ;;  %v617_v15 = vsel %vm616_vm0, %v614_v52, %v615_v54 }
 0x172   : > { %v607_v17 = vpack.c.bf16 %v588_v63, %v602_v62  ;;  %v624_v18 = vsel %vm616_vm0, %v615_v54, %v608_v21  ;;  %v1584_v21 = vld [vmem:[#allocation7 + $0xa8] sm:$0xff]   ;;  %v1037_v38 = vrot.slane %v2008_v35, %v1036_v37  ;;  %v1048_v41 = vunpack.c.l.bf16 %v1985_v12 }
 0x173   : > { %1431 = vmatprep.mubr.bf16.mxu1 %v604_v11  ;;  %v635_v19 = vpack.c.bf16 %v630_v1, %v619_v10  ;;  %v632_v20 = vmul.f32 %v2040_v8, %v624_v18  ;;  %v1585_v8 = vld [vmem:[#allocation7 + $0xb0] sm:$0xff]   ;;  %v1046_v44 = vunpack.c.l.bf16 %v1981_v4  ;;  %v1049_v47 = vunpack.c.h.bf16 %v1985_v12 }
 0x174   : > { %1432 = vmatmul.mubr.bf16.vlgmr.msra.gmra.mrb[0].mxu1 %v605_v46  ;;  %v1052_v59 = vunpack.c.l.bf16 %v1993_v16  ;;  %v1050_v63 = vunpack.c.l.bf16 %v1988_v13  ;;  %v1053_v6 = vunpack.c.h.bf16 %v1993_v16  ;;  %v1051_v11 = vunpack.c.h.bf16 %v1988_v13 }
 0x175   : > { %1440 = vmatpush3.bf16.msra.mxu1 %v1996_v28  ;;  %1435 = vmatprep.mubr.bf16.mxu1 %v606_v14  ;;  %v636_v22 = vpack.c.bf16 %v632_v20, %v617_v15  ;;  %v1586_v28 = vld [vmem:[#allocation7 + $0xb8] sm:$0xff]  }
 0x176   : > { %1441 = vmatprep.subr.bf16.mxu1 %v1580_v2 }
 0x179   : > { %1442 = vmatpush3.bf16.msra.mxu1 %v1580_v2 }
 0x17a   : > { %1443 = vmatprep.subr.bf16.mxu1 %v1581_v23 }
 0x17c   : > { %1436 = vmatmul.mubr.bf16.gmra.mrb[4].mxu1 %v607_v17 }
 0x17d   : > { %1444 = vmatpush3.bf16.msra.mxu1 %v1581_v23  ;;  %1455 = vmatprep.mubr.bf16.mxu1 %v633_v51  ;;  %v1047_v51 = vunpack.c.h.bf16 %v1981_v4 }
 0x17e   : > { %1445 = vmatprep.subr.bf16.mxu1 %v1582_v24 }
 0x181   : > { %1446 = vmatpush3.bf16.msra.mxu1 %v1582_v24 }
 0x182   : > { %1447 = vmatprep.subr.bf16.mxu1 %v1583_v25 }
 0x185   : > { %1448 = vmatpush3.bf16.msra.mxu1 %v1583_v25 }
 0x186   : > { %1449 = vmatprep.subr.bf16.mxu1 %v1584_v21 }
 0x189   : > { %1450 = vmatpush3.bf16.msra.mxu1 %v1584_v21 }
 0x18a   : > { %1451 = vmatprep.subr.bf16.mxu1 %v1585_v8 }
 0x18d   : > { %1452 = vmatpush3.bf16.msra.mxu1 %v1585_v8 }
 0x18e   : > { %1453 = vmatprep.subr.bf16.mxu1 %v1586_v28 }
 0x191   : > { %1454 = vmatpush3.bf16.msra.mxu1 %v1586_v28 }
 0x194   : > { %1456 = vmatmul.mubr.bf16.vlgmr.msra.gmra.mrb[0].mxu1 %v634_v7 }
 0x195   : > { %1459 = vmatprep.mubr.bf16.mxu1 %v635_v19 }
 0x19c   : > { %1460 = vmatmul.mubr.bf16.gmra.mrb[4].mxu1 %v636_v22 }
 0x23b   : > { %v1409_v26 = vpop.f32.mrb[8].mxu0 }
 0x23c   : > { %v752_v27 = vpop.f32.mrb[9].mxu0 }
 0x23d   : > { %v1410_v29 = vpop.f32.mrb[10].mxu0 }
 0x23e   : > { %v755_v31 = vpop.f32.mrb[11].mxu0 }
 0x243   : > { %v1413_v32 = vpop.f32.mrb[12].mxu0 }
 0x244   : > { %v768_v33 = vpop.f32.mrb[13].mxu0 }
 0x245   : > { %v1414_v34 = vpop.f32.mrb[14].mxu0 }
 0x246   : > { %v771_v36 = vpop.f32.mrb[15].mxu0 }
 0x267   : > { %v1457_v40 = vpop.f32.mrb[0].mxu1 }
 0x268   : > { %v1463_v42 = vadd.f32 %v1457_v40, %v1409_v26  ;;  %v995_v43 = vpop.f32.mrb[1].mxu1 }
 0x269   : > { %v1464_v45 = vadd.f32 %v995_v43, %v752_v27  ;;  %v1458_v46 = vpop.f32.mrb[2].mxu1 }
 0x26a   : > { %v1040_v48 = vadd.f32 %v1463_v42, %v1037_v38  ;;  %v1465_v49 = vadd.f32 %v1458_v46, %v1410_v29  ;;  %v998_v50 = vpop.f32.mrb[3].mxu1 }
 0x26b   : > { %v1038_v52 = vadd.f32 %v1464_v45, %v1037_v38  ;;  %v1466_v30 = vadd.f32 %v998_v50, %v755_v31 }
 0x26c   : > { %v1056_v53 = vadd.f32 %v1048_v41, %v1040_v48  ;;  %v1041_v35 = vadd.f32 %v1465_v49, %v1037_v38 }
 0x26d   : > { %v1054_v54 = vadd.f32 %v1046_v44, %v1038_v52  ;;  %v1039_v55 = vadd.f32 %v1466_v30, %v1037_v38 }
 0x26e   : > { %v1057_v39 = vadd.f32 %v1049_v47, %v1041_v35  ;;  %v1064_v60 = vmax.f32 %v1056_v53, 0.0 }
 0x26f   : > { %v1055_v56 = vadd.f32 %v1047_v51, %v1039_v55  ;;  %v1461_v57 = vpop.f32.mrb[4].mxu1  ;;  %v1062_v0 = vmax.f32 %v1054_v54, 0.0 }
 0x270   : > { %v1065_v61 = vmax.f32 %v1057_v39, 0.0  ;;  %v1467_v58 = vadd.f32 %v1461_v57, %v1413_v32  ;;  %v1011_v12 = vpop.f32.mrb[5].mxu1 }
 0x271   : > { %v1063_v4 = vmax.f32 %v1055_v56, 0.0  ;;  %v1468_v3 = vadd.f32 %v1011_v12, %v768_v33  ;;  %v1462_v5 = vpop.f32.mrb[6].mxu1 }
 0x272   : > { %v1304_v62 = vpack.c.bf16 %v1065_v61, %v1064_v60  ;;  %v1044_v7 = vadd.f32 %v1467_v58, %v1037_v38  ;;  %v1469_v9 = vadd.f32 %v1462_v5, %v1414_v34  ;;  %v1014_v10 = vpop.f32.mrb[7].mxu1 }
 0x273   : > { %v1299_v14 = vpack.c.bf16 %v1063_v4, %v1062_v0  ;;  %v1042_v1 = vadd.f32 %v1468_v3, %v1037_v38  ;;  %v1470_v15 = vadd.f32 %v1014_v10, %v771_v36 }
 0x274   : > { %1316 = vst [vmem:[%s244_s11 + $0x8] sm:$0xff] %v1304_v62   ;;  %v1060_v2 = vadd.f32 %v1052_v59, %v1044_v7  ;;  %v1045_v17 = vadd.f32 %v1469_v9, %v1037_v38 }
 0x275   : > { %1300 = vst [vmem:[%s244_s11] sm:$0xff] %v1299_v14   ;;  %v1058_v18 = vadd.f32 %v1050_v63, %v1042_v1  ;;  %v1043_v19 = vadd.f32 %v1470_v15, %v1037_v38 }
 0x276   : > { %v1061_v16 = vadd.f32 %v1053_v6, %v1045_v17  ;;  %v1068_v22 = vmax.f32 %v1060_v2, 0.0 }
 0x277   : > { %v1059_v20 = vadd.f32 %v1051_v11, %v1043_v19  ;;  %v1066_v13 = vmax.f32 %v1058_v18, 0.0 }
 0x278   : > { %v1069_v23 = vmax.f32 %v1061_v16, 0.0 }
 0x279   : > { %v1067_v24 = vmax.f32 %v1059_v20, 0.0 }
 0x27a   : > { %v1314_v25 = vpack.c.bf16 %v1069_v23, %v1068_v22 }
 0x27b   : > { %v1309_v21 = vpack.c.bf16 %v1067_v24, %v1066_v13 }
 0x27c   : > { %1318 = vst [vmem:[%s244_s11 + $0x18] sm:$0xff] %v1314_v25  }
 0x27d   : > { %1317 = vst [vmem:[%s244_s11 + $0x10] sm:$0xff] %v1309_v21  }
 0x27e   : > { %1690 = shalt.err (!%p1687_p1)
}
 0x27f   : > { %s1691_s9 = scalar_lea.hbm %s2108_s28, 512  ;;  %s1695_s25 = scalar_lea.hbm %s2156_s4, 1024 }
 0x280   : > { %p1692_p13 = scmp.ne.s32.totalorder %s2108_s28, %s1691_s9  ;;  %p1696_p4 = scmp.lt.u32.totalorder %s2108_s28, %s2156_s4 }
 0x281   : > { %p1697_p5 = scmp.lt.u32.totalorder %s1695_s25, %s1691_s9  ;;  %p1699_p11 = scmp.lt.u32.totalorder %s1691_s9, %s2108_s28 }
 0x282   : > { %p1693_p6 = pnand %p1692_p13, %p2176_p0 }
 0x283   : > { %p1698_p8 = por %p1697_p5, %p1696_p4 }
 0x284   : > { %p1694_p10 = pneg %p1693_p6 }
 0x285   : > { %p1700_p2 = por %p1699_p11, %p1698_p8 }
 0x287   : > { %p1701_p3 = pnand %p1700_p2, %p1694_p10 }
 0x289   : > { %1704 = shalt.err (!%p1701_p3)
}
 0x28a   : > { %s1756_s11 = smov 64   ;;  %s1757_s30 = smov 4  }
 0x28b   : > { %1489 = dma.vmem_to_hbm [thread:$0]  (%p2176_p0), %s2103_s12, 512, %s2108_s28, %s1111_s27, %s1756_s11, %s1756_s11, %s1757_s30  }
 0x28c PF: > { %s1139_s6 = sand.u32 1, %s1735_s15   ;;  %p2177_p7 = scmp.ne.s32.totalorder %s2161_s22, 0 }
 0x28d   : > { %p2178_p9 = scmp.ge.s32.totalorder %s1747_s18, 2  ;;  %s1140_s7 = scalar_lea.sflag [#allocation4], %s1139_s6 }
 0x28f   : > { %p1503_p12 = pnand %p2178_p9, %p2177_p7 }
 0x291   : > { %1730 = dma.done.wait (!%p1503_p12), %s1140_s7, 512  }
 0x292   : > { %1732 = vsyncadd (!%p1503_p12), %s1140_s7, 4294966784  ;;  %p18_p1 = scmp.ge.s32.totalorder %s1899_s26, 4   ;;  %s2179_s15 = smov %s1739_s16 }
 0x293   : > { %s2180_s16 = smov %s1743_s17  ;;  %s2181_s17 = smov %s1915_s14 }
 0x294   : > { %s2182_s18 = smov %s1899_s26  ;;  %20 = sbr.rel (!%p18_p1) target bundleno = 6 (0x6), region = 91 }
 0x29b   :  { %1145 = vsyncpa [#allocation3], 1 }
 0x29c   :  { %1147 = vsyncpa [#allocation3 + $0x1], 1 }
 0x29d   :  { %1148 = vsyncpa [#allocation6], 1 }
 0x29e   :  { %1149 = vsyncpa [#allocation4], 1 }
 0x29f   :  { %1151 = vsyncpa [#allocation4 + $0x1], 1 }

</bundles_post_ra>
